<compile_context>
chip_gen: v6e
topology: v6e:2x2x1
jax: 0.10.0
libtpu: 0.0.40
codegen_flags: <defaults>
</compile_context>

<pallas_src>
import functools
import math

import jax
import jax.numpy as jnp
from jax import lax
from jax.experimental import pallas as pl
from jax.experimental.pallas import tpu as pltpu


def _msa_kernel(x_ref, wqkv_ref, bqkv_ref, wout_ref, bout_ref, o_ref, *,
                n_heads, head_d, compute_dtype, approx_recip):
    # x_ref: (S, D) (leading batch dim squeezed by the BlockSpec).
    S, D = x_ref.shape
    H = n_heads

    x = x_ref[...].astype(compute_dtype)                       # (S, D)
    x_b = jnp.broadcast_to(x[None], (H, S, D))                 # (H, S, D)

    # Head-batched fused qkv projection (weights already in compute_dtype,
    # softmax scale folded into the q columns by the wrapper):
    #   (H, S, D) @ (H, D, 3*hd) -> (H, S, 3*hd), f32 accumulation.
    qkv = lax.dot_general(
        x_b, wqkv_ref[...],
        dimension_numbers=(((2,), (1,)), ((0,), (0,))),
        preferred_element_type=jnp.float32)
    qkv = qkv + bqkv_ref[...]                                  # (H, 1, 3*hd) bcast over S

    # Per-head lane slices of the fused projection.
    q = qkv[..., 0 * head_d:1 * head_d]                        # (H, S, hd), pre-scaled
    k = qkv[..., 1 * head_d:2 * head_d]                        # (H, S, hd)
    v = qkv[..., 2 * head_d:3 * head_d]                        # (H, S, hd)

    # scores[h] = (q[h]/sqrt(hd)) @ k[h]^T — transpose folded into contraction.
    scores = lax.dot_general(
        q.astype(compute_dtype), k.astype(compute_dtype),
        dimension_numbers=(((2,), (2,)), ((0,), (0,))),
        preferred_element_type=jnp.float32)                    # (H, S, S) f32

    # Numerically-stable softmax with deferred normalization: exp/sum in f32,
    # the unnormalized probabilities feed the value matmul, and the context
    # (H, S, hd) is scaled by 1/l afterwards (EUP reciprocal).
    m = jnp.max(scores, axis=-1, keepdims=True)                # (H, S, 1)
    e = jnp.exp(scores - m)                                    # (H, S, S)
    l = jnp.sum(e, axis=-1, keepdims=True)                     # (H, S, 1)

    ctx = lax.dot_general(
        e.astype(compute_dtype), v.astype(compute_dtype),
        dimension_numbers=(((2,), (1,)), ((0,), (0,))),
        preferred_element_type=jnp.float32)                    # (H, S, hd) f32
    ctx = ctx * pl.reciprocal(l, approx=approx_recip)          # softmax normalization

    # Output projection: out = sum_h ctx[h] @ w_out[h*hd:(h+1)*hd, :] + b_out.
    # One head-batched matmul + an unrolled slab accumulation over H
    # (H-1 VALU adds of (S, D) slabs — no lane concat, no relayout).
    out_h = lax.dot_general(
        ctx.astype(compute_dtype), wout_ref[...],
        dimension_numbers=(((2,), (1,)), ((0,), (0,))),
        preferred_element_type=jnp.float32)                    # (H, S, D) f32
    out = out_h[0]
    for h in range(1, H):
        out = out + out_h[h]
    out = out + bout_ref[...]                                  # (S, D) + (1, D)

    o_ref[...] = out.astype(o_ref.dtype)


def my_msa_pallas(x, w_qkv, b_qkv, w_out, b_out, *, n_heads,
                  compute_dtype=jnp.bfloat16):
    """x: (B, S, D). w_qkv: (D, 3D), b_qkv: (3D,), w_out: (D, D), b_out: (D,).

    compute_dtype: dtype of the MXU matmul operands (accumulation is always
    f32, softmax statistics are always f32).  bf16 by default (v6e/v7x MXU);
    pass jnp.float32 for a strict-accuracy path.
    """
    B, S, D = x.shape
    assert D % n_heads == 0, "hidden_d must be divisible by n_heads"
    H = n_heads
    hd = D // n_heads
    scale = 1.0 / math.sqrt(hd)

    # Head-major weight packing (plain XLA, once, outside the kernel):
    #   w_qkv (D, 3D) -> (H, D, 3*hd), columns per head ordered [q_h | k_h | v_h]
    #   b_qkv (3D,)   -> (H, 1, 3*hd)
    #   w_out (D, D)  -> (H, hd, D)   (rows belonging to head h)
    # The softmax scale is folded into the q columns, and matmul operands are
    # pre-cast to compute_dtype (biases stay f32; they add into f32 accums).
    w_qkv_h = w_qkv.reshape(D, 3, H, hd).transpose(2, 0, 1, 3).reshape(H, D, 3 * hd)
    b_qkv_h = b_qkv.reshape(3, H, hd).transpose(1, 0, 2).reshape(H, 1, 3 * hd)
    qkv_scale = jnp.concatenate(
        [jnp.full((hd,), scale, jnp.float32),
         jnp.ones((2 * hd,), jnp.float32)], axis=0)            # (3*hd,)
    w_qkv_h = (w_qkv_h * qkv_scale).astype(compute_dtype)
    b_qkv_h = (b_qkv_h * qkv_scale).astype(jnp.float32)
    w_out_h = w_out.reshape(H, hd, D).astype(compute_dtype)
    b_out_h = b_out.reshape(1, D).astype(jnp.float32)

    approx_recip = bool(jnp.dtype(compute_dtype) != jnp.dtype(jnp.float32))

    kernel = functools.partial(
        _msa_kernel, n_heads=H, head_d=hd,
        compute_dtype=compute_dtype, approx_recip=approx_recip)

    flops = 2 * B * (S * D * 3 * D        # qkv projection
                     + H * S * S * hd     # scores
                     + H * S * S * hd     # context
                     + S * D * D)         # output projection
    cd_bytes = jnp.dtype(compute_dtype).itemsize
    x_bytes = jnp.dtype(x.dtype).itemsize
    bytes_accessed = (x.size * x_bytes
                      + (w_qkv.size + w_out.size) * cd_bytes
                      + (b_qkv.size + b_out.size) * 4
                      + B * S * D * x_bytes)
    cost = pl.CostEstimate(flops=flops,
                           transcendentals=B * H * S * S,
                           bytes_accessed=bytes_accessed)

    return pl.pallas_call(
        kernel,
        out_shape=jax.ShapeDtypeStruct((B, S, D), x.dtype),
        grid=(B,),
        in_specs=[
            pl.BlockSpec((None, S, D), lambda b: (b, 0, 0)),      # x, batch squeezed
            pl.BlockSpec((H, D, 3 * hd), lambda b: (0, 0, 0)),    # w_qkv (resident)
            pl.BlockSpec((H, 1, 3 * hd), lambda b: (0, 0, 0)),    # b_qkv (resident)
            pl.BlockSpec((H, hd, D), lambda b: (0, 0, 0)),        # w_out (resident)
            pl.BlockSpec((1, D), lambda b: (0, 0)),               # b_out (resident)
        ],
        out_specs=pl.BlockSpec((None, S, D), lambda b: (b, 0, 0)),
        compiler_params=pltpu.CompilerParams(
            dimension_semantics=("parallel",),
            vmem_limit_bytes=32 * 1024 * 1024),
        cost_estimate=cost,
    )(x, w_qkv_h, b_qkv_h, w_out_h, b_out_h)


def my_msa_ref(x, w_qkv, b_qkv, w_out, b_out, *, n_heads):
    """Pure-JAX reference mirroring the PyTorch forward exactly."""
    B, S, D = x.shape
    hd = D // n_heads
    qkv = x @ w_qkv + b_qkv                                     # (B, S, 3D)
    qkv = qkv.reshape(B, S, 3, n_heads, hd).transpose(2, 0, 3, 1, 4)
    q, k, v = qkv[0], qkv[1], qkv[2]                            # (B, H, S, hd)
    scores = jnp.einsum("bhqd,bhkd->bhqk", q, k) / math.sqrt(hd)
    attn = jax.nn.softmax(scores, axis=-1)
    ctx = jnp.einsum("bhqk,bhkd->bhqd", attn, v)                # (B, H, S, hd)
    ctx = ctx.transpose(0, 2, 1, 3).reshape(B, S, D)
    return ctx @ w_out + b_out


if __name__ == "__main__":
    B, S, D, H = 2, 8, 32, 4

    key = jax.random.PRNGKey(0)
    kx, k1, k2, k3, k4 = jax.random.split(key, 5)

    x = jax.random.normal(kx, (B, S, D), dtype=jnp.float32)

    # Deterministic synthetic parameters (uniform, ~nn.Linear default scale).
    lim = 1.0 / math.sqrt(D)
    w_qkv = jax.random.uniform(k1, (D, 3 * D), jnp.float32, -lim, lim)
    b_qkv = jax.random.uniform(k2, (3 * D,), jnp.float32, -lim, lim)
    w_out = jax.random.uniform(k3, (D, D), jnp.float32, -lim, lim)
    b_out = jax.random.uniform(k4, (D,), jnp.float32, -lim, lim)

    ref = my_msa_ref(x, w_qkv, b_qkv, w_out, b_out, n_heads=H)

    # Strict-accuracy path: f32 MXU operands, exact reciprocal.
    out_f32 = my_msa_pallas(x, w_qkv, b_qkv, w_out, b_out, n_heads=H,
                            compute_dtype=jnp.float32)
    out_f32 = jax.block_until_ready(out_f32)
    assert out_f32.shape == (B, S, D)
    assert jnp.allclose(out_f32, ref, atol=1e-4, rtol=1e-4), "f32 path mismatch"

    # Performance path (default): bf16 MXU operands, f32 accumulation/softmax.
    out_bf16 = my_msa_pallas(x, w_qkv, b_qkv, w_out, b_out, n_heads=H)
    out_bf16 = jax.block_until_ready(out_bf16)
    assert out_bf16.shape == (B, S, D)
    assert jnp.allclose(out_bf16, ref, atol=5e-2, rtol=5e-2), "bf16 path mismatch"

    print("KERNEL_OK")
</pallas_src>

<mosaic_0001>
module attributes {stable_mosaic.version = 11 : i64} {
  func.func @_msa_kernel(%arg0: i32, %arg1: memref<1x8x32xf32, #tpu.memory_space<vmem>>, %arg2: memref<4x32x24xf32, #tpu.memory_space<vmem>>, %arg3: memref<4x1x24xf32, #tpu.memory_space<vmem>>, %arg4: memref<4x8x32xf32, #tpu.memory_space<vmem>>, %arg5: memref<1x32xf32, #tpu.memory_space<vmem>>, %arg6: memref<1x8x32xf32, #tpu.memory_space<vmem>>) attributes {dimension_semantics = [#tpu.dimension_semantics<parallel>], iteration_bounds = array<i64: 2>, scalar_prefetch = 0 : i64, scratch_operands = 0 : i64, tpu.core_type = #tpu.core_type<tc>, window_params = [{transform_indices = @transform_0, window_bounds = array<i64: 1, 8, 32>}, {pipeline_mode = #tpu.pipeline_mode<synchronous>, transform_indices = @transform_1, window_bounds = array<i64: 4, 32, 24>}, {pipeline_mode = #tpu.pipeline_mode<synchronous>, transform_indices = @transform_2, window_bounds = array<i64: 4, 1, 24>}, {pipeline_mode = #tpu.pipeline_mode<synchronous>, transform_indices = @transform_3, window_bounds = array<i64: 4, 8, 32>}, {pipeline_mode = #tpu.pipeline_mode<synchronous>, transform_indices = @transform_4, window_bounds = array<i64: 1, 32>}, {transform_indices = @transform_5, window_bounds = array<i64: 1, 8, 32>}]} {
    %c0 = arith.constant 0 : index
    %c0_0 = arith.constant 0 : index
    %c0_1 = arith.constant 0 : index
    %0 = vector.load %arg1[%c0, %c0_0, %c0_1] : memref<1x8x32xf32, #tpu.memory_space<vmem>>, vector<1x8x32xf32>
    %1 = vector.shape_cast %0 : vector<1x8x32xf32> to vector<8x32xf32>
    %2 = vector.shape_cast %1 : vector<8x32xf32> to vector<1x8x32xf32>
    %3 = vector.shape_cast %2 : vector<1x8x32xf32> to vector<1x8x32xf32>
    %4 = vector.broadcast %3 : vector<1x8x32xf32> to vector<4x8x32xf32>
    %c0_2 = arith.constant 0 : index
    %c0_3 = arith.constant 0 : index
    %c0_4 = arith.constant 0 : index
    %5 = vector.load %arg2[%c0_2, %c0_3, %c0_4] : memref<4x32x24xf32, #tpu.memory_space<vmem>>, vector<4x32x24xf32>
    %cst = arith.constant dense<0.000000e+00> : vector<4x8x24xf32>
    %6 = tpu.matmul %4, %5, %cst {dimension_numbers = #tpu.dot_dimension_numbers<[2], [1], [1], [2], [0, 0, 0, 1, 1, 2], [0], [0]>} : vector<4x8x32xf32>, vector<4x32x24xf32>, vector<4x8x24xf32> -> vector<4x8x24xf32>
    %c0_5 = arith.constant 0 : index
    %c0_6 = arith.constant 0 : index
    %c0_7 = arith.constant 0 : index
    %7 = vector.load %arg3[%c0_5, %c0_6, %c0_7] : memref<4x1x24xf32, #tpu.memory_space<vmem>>, vector<4x1x24xf32>
    %8 = vector.broadcast %7 : vector<4x1x24xf32> to vector<4x8x24xf32>
    %9 = arith.addf %6, %8 : vector<4x8x24xf32>
    %10 = vector.extract_strided_slice %9 {offsets = [0, 0, 0], sizes = [4, 8, 8], strides = [1, 1, 1]} : vector<4x8x24xf32> to vector<4x8x8xf32>
    %11 = vector.extract_strided_slice %9 {offsets = [0, 0, 8], sizes = [4, 8, 8], strides = [1, 1, 1]} : vector<4x8x24xf32> to vector<4x8x8xf32>
    %12 = vector.extract_strided_slice %9 {offsets = [0, 0, 16], sizes = [4, 8, 8], strides = [1, 1, 1]} : vector<4x8x24xf32> to vector<4x8x8xf32>
    %cst_8 = arith.constant dense<0.000000e+00> : vector<4x8x8xf32>
    %13 = tpu.matmul %10, %11, %cst_8 {dimension_numbers = #tpu.dot_dimension_numbers<[2], [2], [1], [1], [0, 0, 0, 1, 1, 1], [0], [0]>} : vector<4x8x8xf32>, vector<4x8x8xf32>, vector<4x8x8xf32> -> vector<4x8x8xf32>
    %cst_9 = arith.constant dense<0xFF800000> : vector<4x8xf32>
    %14 = vector.multi_reduction <maximumf>, %13, %cst_9 [2] : vector<4x8x8xf32> to vector<4x8xf32>
    %15 = vector.shape_cast %14 : vector<4x8xf32> to vector<4x8x1xf32>
    %16 = vector.broadcast %15 : vector<4x8x1xf32> to vector<4x8x8xf32>
    %17 = arith.subf %13, %16 : vector<4x8x8xf32>
    %18 = math.exp %17 : vector<4x8x8xf32>
    %cst_10 = arith.constant dense<0.000000e+00> : vector<4x8xf32>
    %19 = vector.multi_reduction <add>, %18, %cst_10 [2] : vector<4x8x8xf32> to vector<4x8xf32>
    %20 = vector.shape_cast %19 : vector<4x8xf32> to vector<4x8x1xf32>
    %cst_11 = arith.constant dense<0.000000e+00> : vector<4x8x8xf32>
    %21 = tpu.matmul %18, %12, %cst_11 {dimension_numbers = #tpu.dot_dimension_numbers<[2], [1], [1], [2], [0, 0, 0, 1, 1, 2], [0], [0]>} : vector<4x8x8xf32>, vector<4x8x8xf32>, vector<4x8x8xf32> -> vector<4x8x8xf32>
    %22 = tpu.reciprocal %20 : vector<4x8x1xf32> -> vector<4x8x1xf32>
    %23 = vector.broadcast %22 : vector<4x8x1xf32> to vector<4x8x8xf32>
    %24 = arith.mulf %21, %23 : vector<4x8x8xf32>
    %c0_12 = arith.constant 0 : index
    %c0_13 = arith.constant 0 : index
    %c0_14 = arith.constant 0 : index
    %25 = vector.load %arg4[%c0_12, %c0_13, %c0_14] : memref<4x8x32xf32, #tpu.memory_space<vmem>>, vector<4x8x32xf32>
    %cst_15 = arith.constant dense<0.000000e+00> : vector<4x8x32xf32>
    %26 = tpu.matmul %24, %25, %cst_15 {dimension_numbers = #tpu.dot_dimension_numbers<[2], [1], [1], [2], [0, 0, 0, 1, 1, 2], [0], [0]>} : vector<4x8x8xf32>, vector<4x8x32xf32>, vector<4x8x32xf32> -> vector<4x8x32xf32>
    %27 = vector.extract_strided_slice %26 {offsets = [0, 0, 0], sizes = [1, 8, 32], strides = [1, 1, 1]} : vector<4x8x32xf32> to vector<1x8x32xf32>
    %28 = vector.shape_cast %27 : vector<1x8x32xf32> to vector<8x32xf32>
    %29 = vector.extract_strided_slice %26 {offsets = [1, 0, 0], sizes = [1, 8, 32], strides = [1, 1, 1]} : vector<4x8x32xf32> to vector<1x8x32xf32>
    %30 = vector.shape_cast %29 : vector<1x8x32xf32> to vector<8x32xf32>
    %31 = arith.addf %28, %30 : vector<8x32xf32>
    %32 = vector.extract_strided_slice %26 {offsets = [2, 0, 0], sizes = [1, 8, 32], strides = [1, 1, 1]} : vector<4x8x32xf32> to vector<1x8x32xf32>
    %33 = vector.shape_cast %32 : vector<1x8x32xf32> to vector<8x32xf32>
    %34 = arith.addf %31, %33 : vector<8x32xf32>
    %35 = vector.extract_strided_slice %26 {offsets = [3, 0, 0], sizes = [1, 8, 32], strides = [1, 1, 1]} : vector<4x8x32xf32> to vector<1x8x32xf32>
    %36 = vector.shape_cast %35 : vector<1x8x32xf32> to vector<8x32xf32>
    %37 = arith.addf %34, %36 : vector<8x32xf32>
    %c0_16 = arith.constant 0 : index
    %c0_17 = arith.constant 0 : index
    %38 = vector.load %arg5[%c0_16, %c0_17] : memref<1x32xf32, #tpu.memory_space<vmem>>, vector<1x32xf32>
    %39 = vector.broadcast %38 : vector<1x32xf32> to vector<8x32xf32>
    %40 = arith.addf %37, %39 : vector<8x32xf32>
    %c0_18 = arith.constant 0 : index
    %c0_19 = arith.constant 0 : index
    %c0_20 = arith.constant 0 : index
    %41 = vector.load %arg6[%c0_18, %c0_19, %c0_20] : memref<1x8x32xf32, #tpu.memory_space<vmem>>, vector<1x8x32xf32>
    %42 = vector.shape_cast %41 : vector<1x8x32xf32> to vector<8x32xf32>
    %43 = vector.shape_cast %40 : vector<8x32xf32> to vector<1x8x32xf32>
    tpu.vector_store %arg6[%c0_18, %c0_19, %c0_20], %43 {strides = array<i32>} : memref<1x8x32xf32, #tpu.memory_space<vmem>>, vector<1x8x32xf32>,
    return
  }
  func.func @transform_0(%arg0: i32) -> (i32, i32, i32) {
    %c0_i32 = arith.constant 0 : i32
    %c0_i32_0 = arith.constant 0 : i32
    %c0_i32_1 = arith.constant 0 : i32
    return %arg0, %c0_i32, %c0_i32_0 : i32, i32, i32
  }
  func.func @transform_1(%arg0: i32) -> (i32, i32, i32) {
    %c0_i32 = arith.constant 0 : i32
    %c0_i32_0 = arith.constant 0 : i32
    %c0_i32_1 = arith.constant 0 : i32
    %c0_i32_2 = arith.constant 0 : i32
    return %c0_i32, %c0_i32_0, %c0_i32_1 : i32, i32, i32
  }
  func.func @transform_2(%arg0: i32) -> (i32, i32, i32) {
    %c0_i32 = arith.constant 0 : i32
    %c0_i32_0 = arith.constant 0 : i32
    %c0_i32_1 = arith.constant 0 : i32
    %c0_i32_2 = arith.constant 0 : i32
    return %c0_i32, %c0_i32_0, %c0_i32_1 : i32, i32, i32
  }
  func.func @transform_3(%arg0: i32) -> (i32, i32, i32) {
    %c0_i32 = arith.constant 0 : i32
    %c0_i32_0 = arith.constant 0 : i32
    %c0_i32_1 = arith.constant 0 : i32
    %c0_i32_2 = arith.constant 0 : i32
    return %c0_i32, %c0_i32_0, %c0_i32_1 : i32, i32, i32
  }
  func.func @transform_4(%arg0: i32) -> (i32, i32) {
    %c0_i32 = arith.constant 0 : i32
    %c0_i32_0 = arith.constant 0 : i32
    %c0_i32_1 = arith.constant 0 : i32
    return %c0_i32, %c0_i32_0 : i32, i32
  }
  func.func @transform_5(%arg0: i32) -> (i32, i32, i32) {
    %c0_i32 = arith.constant 0 : i32
    %c0_i32_0 = arith.constant 0 : i32
    %c0_i32_1 = arith.constant 0 : i32
    return %arg0, %c0_i32, %c0_i32_0 : i32, i32, i32
  }
}

</mosaic_0001>

<bundles_post_ra>
// kernel: tpu_custom_call.1
= control target key start
LH: loop header
LB: loop body
LE: loop exit
PB: predicated region body
PF: predicated region fallthrough
CT: control target
= control target key end

     0   :  { %10 = vsyncpa [#allocation3], 0  ;;  %s2181_s0 = inlined_call_operand.vmem [shape: f32[2,8,32], index: 0, kind: input, shape index: {}]   ;;  %s2182_s1 = inlined_call_operand.vmem [shape: f32[4,32,24], index: 1, kind: input, shape index: {}]   ;;  %s2183_s2 = inlined_call_operand.vmem [shape: f32[4,1,24], index: 2, kind: input, shape index: {}]   ;;  %s2184_s3 = inlined_call_operand.vmem [shape: f32[4,8,32], index: 3, kind: input, shape index: {}]   ;;  %s2185_s4 = inlined_call_operand.vmem [shape: f32[1,32], index: 4, kind: input, shape index: {}]   ;;  %s2186_s5 = inlined_call_operand.hbm [shape: f32[2,8,32], index: 5, kind: output, shape index: {}]  }
   0x1   :  { %12 = vsyncpa [#allocation3 + $0x1], 0  ;;  %s1926_s18 = smov 0   ;;  %s1928_s19 = smov 0  }
   0x2   :  { %s1930_s20 = smov 0   ;;  %s1932_s21 = smov 0  }
   0x3 LB: > { %s1947_s22 = sadd.s32 4294967295, %s1889_s21   ;;  %s1587_s23 = sadd.s32 4294967294, %s1889_s21   ;;  %s1889_s21 = sphi %s1932_s21, %s2192_s21   ;;  %s1885_s20 = sphi %s1930_s20, %s2191_s20   ;;  %s1881_s19 = sphi %s1928_s19, %s2190_s19   ;;  %s1877_s18 = sphi %s1926_s18, %s2189_s18  }
   0x4   : > { %s1951_s24 = sadd.s32 1, %s1889_s21   ;;  %s135_s25 = sadd.s32 1, %s1885_s20 }
   0x5   : > { %s132_s26 = ssub.s32 %s1889_s21, %s1951_s24  ;;  %p145_p0 = scmp.ne.s32.totalorder %s1885_s20, %s1881_s19 }
   0x6   : > { %p133_p1 = scmp.eq.s32.totalorder %s132_s26, 0  ;;  %p146_p2 = scmp.eq.s32.totalorder %s1947_s22, 1 }
   0x7   : > { %p151_p3 = scmp.ne.s32.totalorder %s1881_s19, %s1877_s18  ;;  %p152_p4 = scmp.eq.s32.totalorder %s1587_s23, 1 }
   0x8   : > { %s1962_s27 = scalar_select %p133_p1, %s1885_s20, %s135_s25  }
   0x9   : > { %p1964_p5 = por %p146_p2, %p145_p0  ;;  %p1968_p6 = por %p152_p4, %p151_p3 }
   0xa   : > { %p1590_p7 = scmp.ge.s32.totalorder %s1889_s21, 1  ;;  %p189_p8 = scmp.lt.s32.totalorder %s1889_s21, 3 }
   0xc   : > { %p190_p9 = pnand %p1590_p7, %p189_p8 }
   0xd   : > { %p216_p10 = scmp.lt.s32.totalorder (!%p190_p9), %s1947_s22, 1  ;;  %s1893_s14 = smov (!%p190_p9), 120  }
   0xe   : > { %193 = sbr.rel (%p190_p9) target bundleno = 1109 (0x455), region = 40  ;;  %s1894_s25 = smov (!%p190_p9), 112  }
   0xf   : > { %s213_s12 = sand.u32 (!%p190_p9), 1, %s1881_s19   ;;  %s1619_s16 = sshll.u32 (!%p190_p9), %s1947_s22, 7 }
  0x10   : > { %s1526_s30 = scalar_lea.hbm (!%p190_p9), %s2186_s5, %s1619_s16  ;;  %s1515_s6 = scalar_lea.sflag (!%p190_p9), [#allocation3], %s213_s12 }
  0x11   : > { %s1895_s8 = smov (!%p190_p9), [#allocation2]  }
  0x13   : > { %v224_v0 = vld [vmem:[%s2182_s1 + $0x18] sm:$0xff]  ;;  %v1891_v2 = vmov 0.0   ;;  %v223_v3 = vld [vmem:[%s2182_s1 + $0x10] sm:$0xff]  ;;  %s217_s13 = scalar_select %p216_p10, %s1947_s22, 1  ;;  %v222_v5 = vld [vmem:[%s2182_s1 + $0x8] sm:$0xff]  ;;  %vm1892_vm0 = vmmov 0  }
  0x14   : > { %v228_v1 = vld [vmem:[%s2182_s1 + $0x38] sm:$0xff]  ;;  %1666 = vmatprep.subr.mxu0 %v1891_v2  ;;  %1677 = vmatprep.subr.mxu1 %v1891_v2  ;;  %v227_v4 = vld [vmem:[%s2182_s1 + $0x30] sm:$0xff]  ;;  %v226_v6 = vld [vmem:[%s2182_s1 + $0x28] sm:$0xff]  ;;  %vm265_vm1 = vcmask 261120   ;;  %vm552_vm2 = vcmask 64512   ;;  %s1833_s22 = sshll.u32 %s1895_s8, 4  ;;  %s1834_s22 = int_to_ptr.vmem [resolvable:$false] %s1833_s22 }
  0x15   : > { %1667 = vmatpush3.msra.mxu0 %v224_v0  ;;  %1678 = vmatpush3.msra.mxu1 %v228_v1  ;;  %s1592_s23 = sshll.u32 %s217_s13, 3  ;;  %v221_v7 = vld [vmem:[%s2182_s1] sm:$0xff]  ;;  %v232_v10 = vld [vmem:[%s2182_s1 + $0x58] sm:$0xff]  ;;  %v231_v11 = vld [vmem:[%s2182_s1 + $0x50] sm:$0xff]  ;;  %s1591_s13 = sshll.u32 %s213_s12, 3 }
  0x16   : > { %1668 = vmatprep.subr.mxu0 %v1891_v2  ;;  %1679 = vmatprep.subr.mxu1 %v1891_v2  ;;  %s219_s7 = scalar_lea.vmem %s2181_s0, %s1592_s23  ;;  %v225_v9 = vld [vmem:[%s2182_s1 + $0x20] sm:$0xff]  ;;  %v236_v12 = vld [vmem:[%s2182_s1 + $0x78] sm:$0xff]  ;;  %v230_v13 = vld [vmem:[%s2182_s1 + $0x48] sm:$0xff]  ;;  %s215_s17 = scalar_lea.vmem [#allocation2], %s1591_s13 }
  0x17   : > { %1669 = vmatpush3.msra.mxu0 %v223_v3  ;;  %1680 = vmatpush3.msra.mxu1 %v227_v4  ;;  %v220_v8 = vld [vmem:[%s219_s7] sm:$0xff]  ;;  %v235_v14 = vld [vmem:[%s2182_s1 + $0x70] sm:$0xff]  ;;  %v234_v16 = vld [vmem:[%s2182_s1 + $0x68] sm:$0xff]  ;;  %s1528_s23 = sshll.u32 %s215_s17, 4  ;;  %s1835_s9 = scalar_lea.vmem %s1834_s22, 256  ;;  %s1529_s23 = int_to_ptr.vmem [resolvable:$true] %s1528_s23 }
  0x18   : > { %1670 = vmatprep.subr.mxu0 %v1891_v2  ;;  %1681 = vmatprep.subr.mxu1 %v1891_v2  ;;  %v229_v15 = vld [vmem:[%s2182_s1 + $0x40] sm:$0xff]  ;;  %s1829_s7 = scalar_lea.vmem %s1529_s23, 128  ;;  %p1836_p0 = scmp.lt.s32.totalorder %s1529_s23, %s1834_s22 }
  0x19   : > { %1671 = vmatpush3.msra.mxu0 %v222_v5  ;;  %1674 = vmatprep.mubr.msk.f32.mxu0 %vm1892_vm0, %v1891_v2  ;;  %v233_v17 = vld [vmem:[%s2182_s1 + $0x60] sm:$0xff]  ;;  %p1830_p11 = scmp.ne.s32.totalorder %s1529_s23, %s1829_s7  ;;  %p1837_p1 = scmp.lt.s32.totalorder %s1835_s9, %s1829_s7 }
  0x1a   : > { %1672 = vmatprep.subr.mxu0 %v1891_v2  ;;  %1682 = vmatpush3.msra.mxu1 %v226_v6  ;;  %v1593_v18 = vld [vmem:[%s2183_s2] ss:$0 sm:$0xff]  ;;  %v1594_v21 = vld [vmem:[%s2183_s2 + $0x1] ss:$0 sm:$0xff]  ;;  %v1595_v26 = vld [vmem:[%s2183_s2 + $0x2] ss:$0 sm:$0xff] }
  0x1b   : > { %1673 = vmatpush3.msra.mxu0 %v221_v7  ;;  %1683 = vmatprep.subr.mxu1 %v1891_v2  ;;  %v1596_v29 = vld [vmem:[%s2183_s2 + $0x3] ss:$0 sm:$0xff]  ;;  %p1831_p12 = pnand %p1830_p11, %p1964_p5  ;;  %p1838_p2 = por %p1837_p1, %p1836_p0 }
  0x1c   : > { %1675 = vmatmul.mubr.msk.f32.vlgmr.msra.gmra.mxu0 %vm265_vm1, %v220_v8  ;;  %1688 = vmatprep.subr.mxu0 %v1891_v2 }
  0x1d   : > { %1684 = vmatpush3.msra.mxu1 %v225_v9  ;;  %1689 = vmatpush3.msra.mxu0 %v232_v10  ;;  %p1832_p13 = pneg %p1831_p12 }
  0x1e   : > { %1685 = vmatprep.mubr.msk.f32.mxu1 %vm1892_vm0, %v1891_v2  ;;  %1690 = vmatprep.subr.mxu0 %v1891_v2 }
  0x1f   : > { %1699 = vmatprep.subr.mxu1 %v1891_v2  ;;  %1686 = vmatmul.mubr.msk.f32.vlgmr.msra.gmra.mxu1 %vm265_vm1, %v220_v8  ;;  %p1839_p3 = pnand %p1838_p2, %p1832_p13 }
  0x20   : > { %1691 = vmatpush3.msra.mxu0 %v231_v11  ;;  %1700 = vmatpush3.msra.mxu1 %v236_v12  ;;  %v1206_v11 = vld [vmem:[%s2184_s3] sm:$0xff]  ;;  %v1207_v12 = vld [vmem:[%s2184_s3 + $0x8] sm:$0xff] }
  0x21   : > { %1692 = vmatprep.subr.mxu0 %v1891_v2  ;;  %1701 = vmatprep.subr.mxu1 %v1891_v2 }
  0x22   : > { %1693 = vmatpush3.msra.mxu0 %v230_v13  ;;  %1702 = vmatpush3.msra.mxu1 %v235_v14 }
  0x23   : > { %1694 = vmatprep.subr.mxu0 %v1891_v2  ;;  %1703 = vmatprep.subr.mxu1 %v1891_v2 }
  0x24   : > { %1695 = vmatpush3.msra.mxu0 %v229_v15  ;;  %1696 = vmatprep.mubr.msk.f32.mxu0 %vm1892_vm0, %v1891_v2 }
  0x25   : > { %1704 = vmatpush3.msra.mxu1 %v234_v16  ;;  %1697 = vmatmul.mubr.msk.f32.vlgmr.msra.gmra.mxu0 %vm265_vm1, %v220_v8 }
  0x26   : > { %1705 = vmatprep.subr.mxu1 %v1891_v2  ;;  %1707 = vmatprep.mubr.msk.f32.mxu1 %vm1892_vm0, %v1891_v2 }
  0x27   : > { %1706 = vmatpush3.msra.mxu1 %v233_v17  ;;  %1710 = vmatprep.subr.mxu0 %v1891_v2 }
  0x28   : > { %1708 = vmatmul.mubr.msk.f32.vlgmr.msra.gmra.mxu1 %vm265_vm1, %v220_v8  ;;  %1712 = vmatprep.mubr.msk.f32.mxu0 %vm1892_vm0, %v1891_v2 }
  0x29   : > { %1715 = vmatprep.subr.mxu1 %v1891_v2  ;;  %1717 = vmatprep.mubr.msk.f32.mxu1 %vm1892_vm0, %v1891_v2 }
  0xdc   : > { %v335_v19 = vpop.f32.mrf.mxu0 }
  0xdd   : > { %v336_v20 = vadd.f32 %v1593_v18, %v335_v19 }
  0xde   : > { %v1676_v22 = vpop.f32.mrf.mxu0 }
  0xdf   : > { %v405_v23 = vpop.f32.mrf.mxu1  ;;  %550 = vrot.lane.b32.xlu0 %v336_v20, %s1893_s14 }
  0xe0   : > { %v406_v24 = vadd.f32 %v1594_v21, %v405_v23 }
  0xe1   : > { %v1687_v25 = vpop.f32.mrf.mxu1 }
  0xe2   : > { %v1209_v25 = vld [vmem:[%s2184_s3 + $0x18] sm:$0xff] }
  0xe3   : > { %628 = vrot.lane.b32.xlu0 %v406_v24, %s1893_s14 }
  0xe5   : > { %v475_v27 = vpop.f32.mrf.mxu0 }
  0xe6   : > { %v476_v28 = vadd.f32 %v1595_v26, %v475_v27 }
  0xe7   : > { %v1698_v30 = vpop.f32.mrf.mxu0 }
  0xe8   : > { %v545_v31 = vpop.f32.mrf.mxu1  ;;  %705 = vrot.lane.b32.xlu1 %v476_v28, %s1893_s14 }
  0xe9   : > { %v546_v32 = vadd.f32 %v1596_v29, %v545_v31 }
  0xea   : > { %v1709_v33 = vpop.f32.mrf.mxu1 }
  0xec   : > { %782 = vrot.lane.b32.xlu1 %v546_v32, %s1893_s14 }
  0xf0   : > { %894 = vrot.lane.b32.xlu1 %v336_v20, %s1894_s25 }
 0x151   : > { %v551_v34 = vpop.permute.xlu0 %550 }
 0x152   : > { %1711 = vmatpush3.xpose.msk.msra.mxu0 %vm552_vm2, %v551_v34 }
 0x153   : > { %1720 = vmatprep.subr.mxu0 %v1891_v2 }
 0x155   : > { %1713 = vmatmul.mubr.msk.f32.vlgmr.msra.gmra.mxu0 %vm552_vm2, %v336_v20  ;;  %v629_v35 = vpop.permute.xlu0 %628  ;;  %v1208_v20 = vld [vmem:[%s2184_s3 + $0x10] sm:$0xff] }
 0x156   : > { %1716 = vmatpush3.xpose.msk.msra.mxu1 %vm552_vm2, %v629_v35  ;;  %1722 = vmatprep.mubr.msk.f32.mxu0 %vm1892_vm0, %v1891_v2 }
 0x157   : > { %1725 = vmatprep.subr.mxu1 %v1891_v2 }
 0x159   : > { %1718 = vmatmul.mubr.msk.f32.vlgmr.msra.gmra.mxu1 %vm552_vm2, %v406_v24 }
 0x15a   : > { %v706_v36 = vpop.permute.xlu1 %705  ;;  %1727 = vmatprep.mubr.msk.f32.mxu1 %vm1892_vm0, %v1891_v2 }
 0x15b   : > { %1721 = vmatpush3.xpose.msk.msra.mxu0 %vm552_vm2, %v706_v36 }
 0x15c   : > { %1730 = vmatprep.subr.mxu0 %v1891_v2 }
 0x15e   : > { %1723 = vmatmul.mubr.msk.f32.vlgmr.msra.gmra.mxu0 %vm552_vm2, %v476_v28  ;;  %v783_v37 = vpop.permute.xlu1 %782 }
 0x15f   : > { %1726 = vmatpush3.xpose.msk.msra.mxu1 %vm552_vm2, %v783_v37  ;;  %1732 = vmatprep.mubr.msk.f32.mxu0 %vm1892_vm0, %v1891_v2 }
 0x160   : > { %1735 = vmatprep.subr.mxu1 %v1891_v2 }
 0x162   : > { %1728 = vmatmul.mubr.msk.f32.vlgmr.msra.gmra.mxu1 %vm552_vm2, %v546_v32  ;;  %v895_v38 = vpop.permute.xlu1 %894 }
 0x163   : > { %1731 = vmatpush3.msra.mxu0 %v895_v38  ;;  %1737 = vmatprep.mubr.msk.f32.mxu1 %vm1892_vm0, %v1891_v2 }
 0x164   : > { %1740 = vmatprep.subr.mxu0 %v1891_v2 }
 0x215   : > { %v623_v39 = vpop.f32.mrf.mxu0 }
 0x216   : > { %v858_v40 = vsel %vm552_vm2, %v623_v39, -inf }
 0x217   : > { %859 = vmax.xlane.f32.xlu0 %v858_v40  ;;  %v1714_v41 = vpop.f32.mrf.mxu0 }
 0x219   : > { %v700_v42 = vpop.f32.mrf.mxu1 }
 0x21a   : > { %v861_v43 = vsel %vm552_vm2, %v700_v42, -inf }
 0x21b   : > { %v1719_v44 = vpop.f32.mrf.mxu1  ;;  %862 = vmax.xlane.f32.xlu1 %v861_v43  ;;  %v1617_v43 = vld [vmem:[%s2185_s4] ss:$0 sm:$0xff] }
 0x21e   : > { %v777_v45 = vpop.f32.mrf.mxu0 }
 0x21f   : > { %v864_v46 = vsel %vm552_vm2, %v777_v45, -inf }
 0x220   : > { %865 = vmax.xlane.f32.xlu0 %v864_v46  ;;  %v1724_v47 = vpop.f32.mrf.mxu0 }
 0x222   : > { %v854_v48 = vpop.f32.mrf.mxu1 }
 0x223   : > { %v867_v49 = vsel %vm552_vm2, %v854_v48, -inf }
 0x224   : > { %v1729_v50 = vpop.f32.mrf.mxu1  ;;  %868 = vmax.xlane.f32.xlu0 %v867_v49 }
 0x22c   : > { %1046 = vrot.lane.b32.xlu1 %v476_v28, %s1894_s25 }
 0x230   : > { %1122 = vrot.lane.b32.xlu1 %v546_v32, %s1894_s25 }
 0x23a   : > { %970 = vrot.lane.b32.xlu0 %v406_v24, %s1894_s25 }
 0x2a0   : > { %v860_v51 = vpop.xlane.xlu0 %859 }
 0x2a1   : > { %v870_v52 = vsub.f32 %v623_v39, %v860_v51 }
 0x2a3   : > { %v874_v53 = vmul.f32 1.442695, %v870_v52 }
 0x2a4   : > { %v863_v54 = vpop.xlane.xlu1 %862 }
 0x2a5   : > { %1813 = vpow2.f32 %v874_v53  ;;  %v871_v55 = vsub.f32 %v700_v42, %v863_v54 }
 0x2a7   : > { %v876_v56 = vmul.f32 1.442695, %v871_v55 }
 0x2a8   : > { %v1047_v63 = vpop.permute.xlu1 %1046 }
 0x2a9   : > { %1815 = vpow2.f32 %v876_v56  ;;  %v866_v57 = vpop.xlane.xlu0 %865 }
 0x2aa   : > { %v872_v58 = vsub.f32 %v777_v45, %v866_v57 }
 0x2ac   : > { %v878_v59 = vmul.f32 1.442695, %v872_v58  ;;  %v1123_v5 = vpop.permute.xlu1 %1122 }
 0x2ad   : > { %v869_v60 = vpop.xlane.xlu0 %868 }
 0x2ae   : > { %1817 = vpow2.f32 %v878_v59  ;;  %v873_v61 = vsub.f32 %v854_v48, %v869_v60 }
 0x2b0   : > { %v880_v62 = vmul.f32 1.442695, %v873_v61 }
 0x2b1   : > { %v971_v0 = vpop.permute.xlu0 %970 }
 0x2b2   : > { %v1814_v1 = vpop.eup %1813  ;;  %1819 = vpow2.f32 %v880_v62  ;;  %1736 = vmatpush3.msra.mxu1 %v971_v0 }
 0x2b3   : > { %1733 = vmatmul.mubr.msk.f32.vlgmr.msra.gmra.mxu0 %vm552_vm2, %v1814_v1  ;;  %v882_v3 = vsel %vm552_vm2, %v1814_v1, 0.0  ;;  %1745 = vmatprep.subr.mxu1 %v1891_v2 }
 0x2b4   : > { %1741 = vmatpush3.msra.mxu0 %v1047_v63  ;;  %883 = vadd.xlane.f32.xlu0 %v882_v3 }
 0x2b5   : > { %1742 = vmatprep.mubr.msk.f32.mxu0 %vm1892_vm0, %v1891_v2  ;;  %1750 = vmatprep.subr.mxu0 %v1891_v2 }
 0x2b6   : > { %v1816_v4 = vpop.eup %1815 }
 0x2b7   : > { %1738 = vmatmul.mubr.msk.f32.vlgmr.msra.gmra.mxu1 %vm552_vm2, %v1816_v4  ;;  %v885_v6 = vsel %vm552_vm2, %v1816_v4, 0.0 }
 0x2b8   : > { %1746 = vmatpush3.msra.mxu1 %v1123_v5  ;;  %886 = vadd.xlane.f32.xlu1 %v885_v6 }
 0x2b9   : > { %1747 = vmatprep.mubr.msk.f32.mxu1 %vm1892_vm0, %v1891_v2  ;;  %1755 = vmatprep.subr.mxu1 %v1891_v2 }
 0x2bb   : > { %v1818_v7 = vpop.eup %1817 }
 0x2bc   : > { %1743 = vmatmul.mubr.msk.f32.vlgmr.msra.gmra.mxu0 %vm552_vm2, %v1818_v7  ;;  %v888_v8 = vsel %vm552_vm2, %v1818_v7, 0.0 }
 0x2bd   : > { %889 = vadd.xlane.f32.xlu0 %v888_v8  ;;  %1752 = vmatprep.mubr.msk.f32.mxu0 %vm1892_vm0, %v1891_v2 }
 0x2be   : > { %1751 = vmatpush3.msra.mxu0 %v1206_v11 }
 0x2bf   : > { %v1820_v9 = vpop.eup %1819  ;;  %1760 = vmatprep.subr.mxu0 %v1891_v2 }
 0x2c0   : > { %1748 = vmatmul.mubr.msk.f32.vlgmr.msra.gmra.mxu1 %vm552_vm2, %v1820_v9  ;;  %v891_v10 = vsel %vm552_vm2, %v1820_v9, 0.0 }
 0x2c1   : > { %892 = vadd.xlane.f32.xlu0 %v891_v10  ;;  %1757 = vmatprep.mubr.msk.f32.mxu1 %vm1892_vm0, %v1891_v2 }
 0x2c2   : > { %1756 = vmatpush3.msra.mxu1 %v1207_v12 }
 0x2c3   : > { %1765 = vmatprep.subr.mxu1 %v1891_v2 }
 0x33d   : > { %v884_v13 = vpop.xlane.xlu0 %883 }
 0x33e   : > { %1821 = vrcp.f32 %v884_v13 }
 0x341   : > { %v887_v14 = vpop.xlane.xlu1 %886 }
 0x342   : > { %1823 = vrcp.f32 %v887_v14 }
 0x346   : > { %v890_v15 = vpop.xlane.xlu0 %889 }
 0x347   : > { %1825 = vrcp.f32 %v890_v15 }
 0x34a   : > { %v893_v16 = vpop.xlane.xlu0 %892 }
 0x34b   : > { %v1822_v17 = vpop.eup %1821  ;;  %1827 = vrcp.f32 %v893_v16 }
 0x34f   : > { %v1824_v22 = vpop.eup %1823 }
 0x354   : > { %v1826_v27 = vpop.eup %1825 }
 0x358   : > { %v1828_v31 = vpop.eup %1827 }
 0x373   : > { %v966_v18 = vpop.f32.mrf.mxu0 }
 0x374   : > { %v1202_v19 = vmul.f32 %v1822_v17, %v966_v18 }
 0x375   : > { %v1734_v21 = vpop.f32.mrf.mxu0 }
 0x376   : > { %1753 = vmatmul.mubr.msk.f32.vlgmr.msra.gmra.mxu0 %vm552_vm2, %v1202_v19 }
 0x377   : > { %v1042_v23 = vpop.f32.mrf.mxu1  ;;  %1761 = vmatpush3.msra.mxu0 %v1208_v20  ;;  %1762 = vmatprep.mubr.msk.f32.mxu0 %vm1892_vm0, %v1891_v2 }
 0x378   : > { %v1203_v24 = vmul.f32 %v1824_v22, %v1042_v23 }
 0x379   : > { %v1739_v26 = vpop.f32.mrf.mxu1 }
 0x37a   : > { %1758 = vmatmul.mubr.msk.f32.vlgmr.msra.gmra.mxu1 %vm552_vm2, %v1203_v24 }
 0x37b   : > { %1766 = vmatpush3.msra.mxu1 %v1209_v25  ;;  %1767 = vmatprep.mubr.msk.f32.mxu1 %vm1892_vm0, %v1891_v2 }
 0x37c   : > { %v1118_v28 = vpop.f32.mrf.mxu0 }
 0x37d   : > { %v1204_v29 = vmul.f32 %v1826_v27, %v1118_v28 }
 0x37e   : > { %v1744_v30 = vpop.f32.mrf.mxu0 }
 0x37f   : > { %1763 = vmatmul.mubr.msk.f32.vlgmr.msra.gmra.mxu0 %vm552_vm2, %v1204_v29 }
 0x380   : > { %v1194_v32 = vpop.f32.mrf.mxu1 }
 0x381   : > { %v1205_v33 = vmul.f32 %v1828_v31, %v1194_v32 }
 0x382   : > { %v1749_v34 = vpop.f32.mrf.mxu1 }
 0x383   : > { %1768 = vmatmul.mubr.msk.f32.vlgmr.msra.gmra.mxu1 %vm552_vm2, %v1205_v33 }
 0x436   : > { %v1279_v35 = vpop.f32.mrf.mxu0 }
 0x438   : > { %v1754_v36 = vpop.f32.mrf.mxu0 }
 0x43a   : > { %v1352_v37 = vpop.f32.mrf.mxu1 }
 0x43b   : > { %v1502_v39 = vadd.f32 %v1352_v37, %v1279_v35 }
 0x43c   : > { %v1759_v38 = vpop.f32.mrf.mxu1 }
 0x43f   : > { %v1425_v2 = vpop.f32.mrf.mxu0 }
 0x440   : > { %v1503_v41 = vadd.f32 %v1502_v39, %v1425_v2 }
 0x441   : > { %v1764_v40 = vpop.f32.mrf.mxu0 }
 0x443   : > { %v1498_v42 = vpop.f32.mrf.mxu1 }
 0x444   : > { %v1504_v44 = vadd.f32 %v1503_v41, %v1498_v42 }
 0x445   : > { %v1769_v45 = vpop.f32.mrf.mxu1 }
 0x446   : > { %v1512_v46 = vadd.f32 %v1617_v43, %v1504_v44 }
 0x448   : > { %1513 = vst.msk [vmem:[%s215_s17] sm:$0xff] %vm265_vm1, %v1512_v46 }
 0x449   : > { %1842 = shalt.err (!%p1839_p3)
}
 0x44a   : > { %s1843_s10 = scalar_lea.hbm %s1526_s30, 128  ;;  %s1847_s13 = scalar_lea.hbm %s2186_s5, 256 }
 0x44b   : > { %p1844_p4 = scmp.ne.s32.totalorder %s1526_s30, %s1843_s10  ;;  %p1848_p9 = scmp.lt.s32.totalorder %s1526_s30, %s2186_s5 }
 0x44c   : > { %p1849_p10 = scmp.lt.s32.totalorder %s1847_s13, %s1843_s10 }
 0x44d   : > { %p1845_p7 = pnand %p1844_p4, %p1964_p5 }
 0x44e   : > { %p1850_p11 = por %p1849_p10, %p1848_p9 }
 0x44f   : > { %p1846_p8 = pneg %p1845_p7 }
 0x451   : > { %p1851_p12 = pnand %p1850_p11, %p1846_p8 }
 0x453   : > { %1854 = shalt.err (!%p1851_p12)
}
 0x454   : > { %1770 = dma.vmem_to_hbm [thread:$0]  (%p1964_p5), %s1529_s23, 128, %s1526_s30, %s1515_s6  }
 0x455 PF: > { %p1776_p13 = scmp.ge.s32.totalorder %s1889_s21, 2  ;;  %s1540_s16 = sand.u32 1, %s1877_s18  }
 0x456   : > { %s1541_s17 = scalar_lea.sflag [#allocation3], %s1540_s16 }
 0x457   : > { %p1773_p0 = pnand %p1776_p13, %p1968_p6 }
 0x459   : > { %p1774_p1 = pneg %p1773_p0 }
 0x45b   : > { %1872 = dma.done.wait (%p1774_p1), %s1541_s17, 128  }
 0x45c   : > { %1874 = vsyncadd (%p1774_p1), %s1541_s17, 4294967168  ;;  %p15_p2 = scmp.ge.s32.totalorder %s1951_s24, 4   ;;  %s2189_s18 = smov %s1881_s19 }
 0x45d   : > { %s2190_s19 = smov %s1885_s20  ;;  %s2191_s20 = smov %s1962_s27 }
 0x45e   : > { %s2192_s21 = smov %s1951_s24  ;;  %17 = sbr.rel (!%p15_p2) target bundleno = 3 (0x3), region = 75 }
 0x463   :  { %1546 = vsyncpa [#allocation3], 1 }
 0x464   :  { %1548 = vsyncpa [#allocation3 + $0x1], 1 }

</bundles_post_ra>
